<compile_context>
chip_gen: v5e
topology: v5e:2x2
jax: 0.10.0
libtpu: 0.0.40
codegen_flags: <defaults>
</compile_context>

<pallas_src>
import jax
import jax.numpy as jnp
from jax.experimental import pallas as pl
from jax.experimental.pallas import tpu as pltpu

NUM_FEATURES = 16
EMBED = 32
NUM_LAYERS = 5          # number of hidden (E -> E) layers
MAX_TILE_N = 2048       # rows per grid step; >=1024 amortizes ~0.35us/step overhead


def _round_up(a, b):
    return ((a + b - 1) // b) * b


def mlp_kernel(x_ref, w_in_ref, b_in_ref, w_hid_ref, b_hid_ref,
               w_out_ref, b_out_ref, out_ref, hid_ref):
    """One row-tile of the MLP.

    x_ref      : (TILE_N, F)
    w_in_ref   : (F, E)       b_in_ref  : (1, E)
    w_hid_ref  : (L, E, E)    b_hid_ref : (L, 1, E)
    w_out_ref  : (1, E)       b_out_ref : (1, 1)
    out_ref    : (TILE_N, 1)  hid_ref   : (TILE_N, E)
    """
    x = x_ref[...]
    if x.dtype != jnp.float32:        # avoid a redundant elementwise pass when already f32
        x = x.astype(jnp.float32)

    # input layer + ReLU (MXU)
    h = jnp.dot(x, w_in_ref[...], preferred_element_type=jnp.float32)
    h = jnp.maximum(h + b_in_ref[...], 0.0)

    # hidden layers + ReLU (static unroll, L is small; weights VMEM-resident)
    for l in range(w_hid_ref.shape[0]):
        h = jnp.dot(h, w_hid_ref[l], preferred_element_type=jnp.float32)
        h = jnp.maximum(h + b_hid_ref[l], 0.0)     # (1, E) bias: free sublane broadcast

    hid_ref[...] = h.astype(hid_ref.dtype)

    # output layer (no activation): width-1 matmul replaced by VPU mul + lane reduce.
    o = jnp.sum(h * w_out_ref[...], axis=-1, keepdims=True) + b_out_ref[...]
    out_ref[...] = o.astype(out_ref.dtype)


def nn_simple_forward(x, params):
    """params = (w_in, b_in, w_hid, b_hid, w_out_row, b_out); weights as (in, out)."""
    w_in, b_in, w_hid, b_hid, w_out_row, b_out = params
    n, f = x.shape
    e = w_in.shape[1]

    # Row tile: big enough to amortize per-step overhead, small enough that
    # double-buffered (x + hid + out) stays far below even v7x's scoped VMEM.
    tile_n = min(MAX_TILE_N, _round_up(n, 8))
    n_pad = _round_up(n, tile_n)
    if n_pad != n:
        x = jnp.pad(x, ((0, n_pad - n), (0, 0)))

    grid = (n_pad // tile_n,)

    out, hid = pl.pallas_call(
        mlp_kernel,
        out_shape=(
            jax.ShapeDtypeStruct((n_pad, 1), jnp.float32),
            jax.ShapeDtypeStruct((n_pad, e), jnp.float32),
        ),
        grid=grid,
        in_specs=[
            pl.BlockSpec((tile_n, f), lambda i: (i, 0)),     # streamed x tile
            pl.BlockSpec(w_in.shape, lambda i: (0, 0)),      # resident weights
            pl.BlockSpec(b_in.shape, lambda i: (0, 0)),
            pl.BlockSpec(w_hid.shape, lambda i: (0, 0, 0)),
            pl.BlockSpec(b_hid.shape, lambda i: (0, 0, 0)),
            pl.BlockSpec(w_out_row.shape, lambda i: (0, 0)),
            pl.BlockSpec(b_out.shape, lambda i: (0, 0)),
        ],
        out_specs=(
            pl.BlockSpec((tile_n, 1), lambda i: (i, 0)),
            pl.BlockSpec((tile_n, e), lambda i: (i, 0)),
        ),
        compiler_params=pltpu.CompilerParams(
            dimension_semantics=("parallel",)),              # v7x megacore sharding
    )(x, w_in, b_in, w_hid, b_hid, w_out_row, b_out)

    if n_pad != n:
        out = out[:n]
        hid = hid[:n]
    return out, hid


def init_params(key, num_features=NUM_FEATURES, embed=EMBED, num_layers=NUM_LAYERS):
    """Deterministic synthetic init (Kaiming-uniform-ish like torch.nn.Linear)."""
    keys = jax.random.split(key, 3)

    def lin(k, fan_in, fan_out):
        bound = 1.0 / jnp.sqrt(fan_in)
        kw, kb = jax.random.split(k)
        w = jax.random.uniform(kw, (fan_in, fan_out), jnp.float32, -bound, bound)
        b = jax.random.uniform(kb, (fan_out,), jnp.float32, -bound, bound)
        return w, b

    w_in, b_in = lin(keys[0], num_features, embed)
    hkeys = jax.random.split(keys[1], num_layers)
    hw, hb = [], []
    for l in range(num_layers):
        w, b = lin(hkeys[l], embed, embed)
        hw.append(w)
        hb.append(b)
    w_hid = jnp.stack(hw, axis=0)                                 # (L, E, E)
    b_hid = jnp.stack(hb, axis=0).reshape(num_layers, 1, embed)   # (L, 1, E)
    w_out, b_out = lin(keys[2], embed, 1)
    w_out_row = w_out.reshape(1, embed)                           # (1, E)

    return (w_in, b_in.reshape(1, embed), w_hid, b_hid,
            w_out_row, b_out.reshape(1, 1))


def reference_forward(x, params):
    w_in, b_in, w_hid, b_hid, w_out_row, b_out = params
    h = jnp.maximum(x @ w_in + b_in, 0.0)
    for l in range(w_hid.shape[0]):
        h = jnp.maximum(h @ w_hid[l] + b_hid[l], 0.0)
    o = h @ w_out_row.T + b_out
    return o, h


if __name__ == "__main__":
    key = jax.random.PRNGKey(0)
    kx, kp = jax.random.split(key)

    num_nodes = 8
    x = jax.random.normal(kx, (num_nodes, NUM_FEATURES), jnp.float32)
    params = init_params(kp)

    out, hidden = nn_simple_forward(x, params)
    out = jax.block_until_ready(out)
    hidden = jax.block_until_ready(hidden)

    ref_out, ref_hidden = reference_forward(x, params)
    assert out.shape == (num_nodes, 1)
    assert hidden.shape == (num_nodes, EMBED)
    assert jnp.allclose(out, ref_out, atol=1e-5, rtol=1e-5)
    assert jnp.allclose(hidden, ref_hidden, atol=1e-5, rtol=1e-5)

    print("KERNEL_OK")
</pallas_src>

<mosaic_0001>
module attributes {stable_mosaic.version = 11 : i64} {
  func.func @mlp_kernel(%arg0: i32, %arg1: memref<8x16xf32, #tpu.memory_space<vmem>>, %arg2: memref<16x32xf32, #tpu.memory_space<vmem>>, %arg3: memref<1x32xf32, #tpu.memory_space<vmem>>, %arg4: memref<5x32x32xf32, #tpu.memory_space<vmem>>, %arg5: memref<5x1x32xf32, #tpu.memory_space<vmem>>, %arg6: memref<1x32xf32, #tpu.memory_space<vmem>>, %arg7: memref<1x1xf32, #tpu.memory_space<vmem>>, %arg8: memref<8x1xf32, #tpu.memory_space<vmem>>, %arg9: memref<8x32xf32, #tpu.memory_space<vmem>>) attributes {dimension_semantics = [#tpu.dimension_semantics<parallel>], iteration_bounds = array<i64: 1>, scalar_prefetch = 0 : i64, scratch_operands = 0 : i64, tpu.core_type = #tpu.core_type<tc>, window_params = [{transform_indices = @transform_0, window_bounds = array<i64: 8, 16>}, {pipeline_mode = #tpu.pipeline_mode<synchronous>, transform_indices = @transform_1, window_bounds = array<i64: 16, 32>}, {pipeline_mode = #tpu.pipeline_mode<synchronous>, transform_indices = @transform_2, window_bounds = array<i64: 1, 32>}, {pipeline_mode = #tpu.pipeline_mode<synchronous>, transform_indices = @transform_3, window_bounds = array<i64: 5, 32, 32>}, {pipeline_mode = #tpu.pipeline_mode<synchronous>, transform_indices = @transform_4, window_bounds = array<i64: 5, 1, 32>}, {pipeline_mode = #tpu.pipeline_mode<synchronous>, transform_indices = @transform_5, window_bounds = array<i64: 1, 32>}, {pipeline_mode = #tpu.pipeline_mode<synchronous>, transform_indices = @transform_6, window_bounds = array<i64: 1, 1>}, {transform_indices = @transform_7, window_bounds = array<i64: 8, 1>}, {transform_indices = @transform_8, window_bounds = array<i64: 8, 32>}]} {
    %c0 = arith.constant 0 : index
    %c0_0 = arith.constant 0 : index
    %0 = vector.load %arg1[%c0, %c0_0] : memref<8x16xf32, #tpu.memory_space<vmem>>, vector<8x16xf32>
    %c0_1 = arith.constant 0 : index
    %c0_2 = arith.constant 0 : index
    %1 = vector.load %arg2[%c0_1, %c0_2] : memref<16x32xf32, #tpu.memory_space<vmem>>, vector<16x32xf32>
    %cst = arith.constant dense<0.000000e+00> : vector<8x32xf32>
    %2 = tpu.matmul %0, %1, %cst {dimension_numbers = #tpu.dot_dimension_numbers<[1], [0], [0], [1], [0, 0, 1, 1], [], []>} : vector<8x16xf32>, vector<16x32xf32>, vector<8x32xf32> -> vector<8x32xf32>
    %c0_3 = arith.constant 0 : index
    %c0_4 = arith.constant 0 : index
    %3 = vector.load %arg3[%c0_3, %c0_4] : memref<1x32xf32, #tpu.memory_space<vmem>>, vector<1x32xf32>
    %4 = vector.broadcast %3 : vector<1x32xf32> to vector<8x32xf32>
    %5 = arith.addf %2, %4 : vector<8x32xf32>
    %cst_5 = arith.constant 0.000000e+00 : f32
    %6 = vector.broadcast %cst_5 : f32 to vector<8x32xf32>
    %7 = arith.maximumf %5, %6 : vector<8x32xf32>
    %c0_6 = arith.constant 0 : index
    %c0_7 = arith.constant 0 : index
    %c0_8 = arith.constant 0 : index
    %8 = vector.load %arg4[%c0_6, %c0_7, %c0_8] : memref<5x32x32xf32, #tpu.memory_space<vmem>>, vector<1x32x32xf32>
    %9 = vector.shape_cast %8 : vector<1x32x32xf32> to vector<32x32xf32>
    %cst_9 = arith.constant dense<0.000000e+00> : vector<8x32xf32>
    %10 = tpu.matmul %7, %9, %cst_9 {dimension_numbers = #tpu.dot_dimension_numbers<[1], [0], [0], [1], [0, 0, 1, 1], [], []>} : vector<8x32xf32>, vector<32x32xf32>, vector<8x32xf32> -> vector<8x32xf32>
    %c0_10 = arith.constant 0 : index
    %c0_11 = arith.constant 0 : index
    %c0_12 = arith.constant 0 : index
    %11 = vector.load %arg5[%c0_10, %c0_11, %c0_12] : memref<5x1x32xf32, #tpu.memory_space<vmem>>, vector<1x1x32xf32>
    %12 = vector.shape_cast %11 : vector<1x1x32xf32> to vector<1x32xf32>
    %13 = vector.broadcast %12 : vector<1x32xf32> to vector<8x32xf32>
    %14 = arith.addf %10, %13 : vector<8x32xf32>
    %cst_13 = arith.constant 0.000000e+00 : f32
    %15 = vector.broadcast %cst_13 : f32 to vector<8x32xf32>
    %16 = arith.maximumf %14, %15 : vector<8x32xf32>
    %c1 = arith.constant 1 : index
    %c0_14 = arith.constant 0 : index
    %c0_15 = arith.constant 0 : index
    %17 = vector.load %arg4[%c1, %c0_14, %c0_15] : memref<5x32x32xf32, #tpu.memory_space<vmem>>, vector<1x32x32xf32>
    %18 = vector.shape_cast %17 : vector<1x32x32xf32> to vector<32x32xf32>
    %cst_16 = arith.constant dense<0.000000e+00> : vector<8x32xf32>
    %19 = tpu.matmul %16, %18, %cst_16 {dimension_numbers = #tpu.dot_dimension_numbers<[1], [0], [0], [1], [0, 0, 1, 1], [], []>} : vector<8x32xf32>, vector<32x32xf32>, vector<8x32xf32> -> vector<8x32xf32>
    %c1_17 = arith.constant 1 : index
    %c0_18 = arith.constant 0 : index
    %c0_19 = arith.constant 0 : index
    %20 = vector.load %arg5[%c1_17, %c0_18, %c0_19] : memref<5x1x32xf32, #tpu.memory_space<vmem>>, vector<1x1x32xf32>
    %21 = vector.shape_cast %20 : vector<1x1x32xf32> to vector<1x32xf32>
    %22 = vector.broadcast %21 : vector<1x32xf32> to vector<8x32xf32>
    %23 = arith.addf %19, %22 : vector<8x32xf32>
    %cst_20 = arith.constant 0.000000e+00 : f32
    %24 = vector.broadcast %cst_20 : f32 to vector<8x32xf32>
    %25 = arith.maximumf %23, %24 : vector<8x32xf32>
    %c2 = arith.constant 2 : index
    %c0_21 = arith.constant 0 : index
    %c0_22 = arith.constant 0 : index
    %26 = vector.load %arg4[%c2, %c0_21, %c0_22] : memref<5x32x32xf32, #tpu.memory_space<vmem>>, vector<1x32x32xf32>
    %27 = vector.shape_cast %26 : vector<1x32x32xf32> to vector<32x32xf32>
    %cst_23 = arith.constant dense<0.000000e+00> : vector<8x32xf32>
    %28 = tpu.matmul %25, %27, %cst_23 {dimension_numbers = #tpu.dot_dimension_numbers<[1], [0], [0], [1], [0, 0, 1, 1], [], []>} : vector<8x32xf32>, vector<32x32xf32>, vector<8x32xf32> -> vector<8x32xf32>
    %c2_24 = arith.constant 2 : index
    %c0_25 = arith.constant 0 : index
    %c0_26 = arith.constant 0 : index
    %29 = vector.load %arg5[%c2_24, %c0_25, %c0_26] : memref<5x1x32xf32, #tpu.memory_space<vmem>>, vector<1x1x32xf32>
    %30 = vector.shape_cast %29 : vector<1x1x32xf32> to vector<1x32xf32>
    %31 = vector.broadcast %30 : vector<1x32xf32> to vector<8x32xf32>
    %32 = arith.addf %28, %31 : vector<8x32xf32>
    %cst_27 = arith.constant 0.000000e+00 : f32
    %33 = vector.broadcast %cst_27 : f32 to vector<8x32xf32>
    %34 = arith.maximumf %32, %33 : vector<8x32xf32>
    %c3 = arith.constant 3 : index
    %c0_28 = arith.constant 0 : index
    %c0_29 = arith.constant 0 : index
    %35 = vector.load %arg4[%c3, %c0_28, %c0_29] : memref<5x32x32xf32, #tpu.memory_space<vmem>>, vector<1x32x32xf32>
    %36 = vector.shape_cast %35 : vector<1x32x32xf32> to vector<32x32xf32>
    %cst_30 = arith.constant dense<0.000000e+00> : vector<8x32xf32>
    %37 = tpu.matmul %34, %36, %cst_30 {dimension_numbers = #tpu.dot_dimension_numbers<[1], [0], [0], [1], [0, 0, 1, 1], [], []>} : vector<8x32xf32>, vector<32x32xf32>, vector<8x32xf32> -> vector<8x32xf32>
    %c3_31 = arith.constant 3 : index
    %c0_32 = arith.constant 0 : index
    %c0_33 = arith.constant 0 : index
    %38 = vector.load %arg5[%c3_31, %c0_32, %c0_33] : memref<5x1x32xf32, #tpu.memory_space<vmem>>, vector<1x1x32xf32>
    %39 = vector.shape_cast %38 : vector<1x1x32xf32> to vector<1x32xf32>
    %40 = vector.broadcast %39 : vector<1x32xf32> to vector<8x32xf32>
    %41 = arith.addf %37, %40 : vector<8x32xf32>
    %cst_34 = arith.constant 0.000000e+00 : f32
    %42 = vector.broadcast %cst_34 : f32 to vector<8x32xf32>
    %43 = arith.maximumf %41, %42 : vector<8x32xf32>
    %c4 = arith.constant 4 : index
    %c0_35 = arith.constant 0 : index
    %c0_36 = arith.constant 0 : index
    %44 = vector.load %arg4[%c4, %c0_35, %c0_36] : memref<5x32x32xf32, #tpu.memory_space<vmem>>, vector<1x32x32xf32>
    %45 = vector.shape_cast %44 : vector<1x32x32xf32> to vector<32x32xf32>
    %cst_37 = arith.constant dense<0.000000e+00> : vector<8x32xf32>
    %46 = tpu.matmul %43, %45, %cst_37 {dimension_numbers = #tpu.dot_dimension_numbers<[1], [0], [0], [1], [0, 0, 1, 1], [], []>} : vector<8x32xf32>, vector<32x32xf32>, vector<8x32xf32> -> vector<8x32xf32>
    %c4_38 = arith.constant 4 : index
    %c0_39 = arith.constant 0 : index
    %c0_40 = arith.constant 0 : index
    %47 = vector.load %arg5[%c4_38, %c0_39, %c0_40] : memref<5x1x32xf32, #tpu.memory_space<vmem>>, vector<1x1x32xf32>
    %48 = vector.shape_cast %47 : vector<1x1x32xf32> to vector<1x32xf32>
    %49 = vector.broadcast %48 : vector<1x32xf32> to vector<8x32xf32>
    %50 = arith.addf %46, %49 : vector<8x32xf32>
    %cst_41 = arith.constant 0.000000e+00 : f32
    %51 = vector.broadcast %cst_41 : f32 to vector<8x32xf32>
    %52 = arith.maximumf %50, %51 : vector<8x32xf32>
    %c0_42 = arith.constant 0 : index
    %c0_43 = arith.constant 0 : index
    %53 = vector.load %arg9[%c0_42, %c0_43] : memref<8x32xf32, #tpu.memory_space<vmem>>, vector<8x32xf32>
    tpu.vector_store %arg9[%c0_42, %c0_43], %52 {strides = array<i32>} : memref<8x32xf32, #tpu.memory_space<vmem>>, vector<8x32xf32>,
    %c0_44 = arith.constant 0 : index
    %c0_45 = arith.constant 0 : index
    %54 = vector.load %arg6[%c0_44, %c0_45] : memref<1x32xf32, #tpu.memory_space<vmem>>, vector<1x32xf32>
    %55 = vector.broadcast %54 : vector<1x32xf32> to vector<8x32xf32>
    %56 = arith.mulf %52, %55 : vector<8x32xf32>
    %cst_46 = arith.constant dense<0.000000e+00> : vector<8xf32>
    %57 = vector.multi_reduction <add>, %56, %cst_46 [1] : vector<8x32xf32> to vector<8xf32>
    %58 = vector.shape_cast %57 : vector<8xf32> to vector<8x1xf32>
    %c0_47 = arith.constant 0 : index
    %c0_48 = arith.constant 0 : index
    %59 = vector.load %arg7[%c0_47, %c0_48] : memref<1x1xf32, #tpu.memory_space<vmem>>, vector<1x1xf32>
    %60 = vector.broadcast %59 : vector<1x1xf32> to vector<8x1xf32>
    %61 = arith.addf %58, %60 : vector<8x1xf32>
    %c0_49 = arith.constant 0 : index
    %c0_50 = arith.constant 0 : index
    %62 = vector.load %arg8[%c0_49, %c0_50] : memref<8x1xf32, #tpu.memory_space<vmem>>, vector<8x1xf32>
    tpu.vector_store %arg8[%c0_49, %c0_50], %61 {strides = array<i32>} : memref<8x1xf32, #tpu.memory_space<vmem>>, vector<8x1xf32>,
    return
  }
  func.func @transform_0(%arg0: i32) -> (i32, i32) {
    %c0_i32 = arith.constant 0 : i32
    %c0_i32_0 = arith.constant 0 : i32
    return %arg0, %c0_i32 : i32, i32
  }
  func.func @transform_1(%arg0: i32) -> (i32, i32) {
    %c0_i32 = arith.constant 0 : i32
    %c0_i32_0 = arith.constant 0 : i32
    %c0_i32_1 = arith.constant 0 : i32
    return %c0_i32, %c0_i32_0 : i32, i32
  }
  func.func @transform_2(%arg0: i32) -> (i32, i32) {
    %c0_i32 = arith.constant 0 : i32
    %c0_i32_0 = arith.constant 0 : i32
    %c0_i32_1 = arith.constant 0 : i32
    return %c0_i32, %c0_i32_0 : i32, i32
  }
  func.func @transform_3(%arg0: i32) -> (i32, i32, i32) {
    %c0_i32 = arith.constant 0 : i32
    %c0_i32_0 = arith.constant 0 : i32
    %c0_i32_1 = arith.constant 0 : i32
    %c0_i32_2 = arith.constant 0 : i32
    return %c0_i32, %c0_i32_0, %c0_i32_1 : i32, i32, i32
  }
  func.func @transform_4(%arg0: i32) -> (i32, i32, i32) {
    %c0_i32 = arith.constant 0 : i32
    %c0_i32_0 = arith.constant 0 : i32
    %c0_i32_1 = arith.constant 0 : i32
    %c0_i32_2 = arith.constant 0 : i32
    return %c0_i32, %c0_i32_0, %c0_i32_1 : i32, i32, i32
  }
  func.func @transform_5(%arg0: i32) -> (i32, i32) {
    %c0_i32 = arith.constant 0 : i32
    %c0_i32_0 = arith.constant 0 : i32
    %c0_i32_1 = arith.constant 0 : i32
    return %c0_i32, %c0_i32_0 : i32, i32
  }
  func.func @transform_6(%arg0: i32) -> (i32, i32) {
    %c0_i32 = arith.constant 0 : i32
    %c0_i32_0 = arith.constant 0 : i32
    %c0_i32_1 = arith.constant 0 : i32
    return %c0_i32, %c0_i32_0 : i32, i32
  }
  func.func @transform_7(%arg0: i32) -> (i32, i32) {
    %c0_i32 = arith.constant 0 : i32
    %c0_i32_0 = arith.constant 0 : i32
    return %arg0, %c0_i32 : i32, i32
  }
  func.func @transform_8(%arg0: i32) -> (i32, i32) {
    %c0_i32 = arith.constant 0 : i32
    %c0_i32_0 = arith.constant 0 : i32
    return %arg0, %c0_i32 : i32, i32
  }
}

</mosaic_0001>

<bundles_post_ra>
// kernel: tpu_custom_call.1
= control target key start
LH: loop header
LB: loop body
LE: loop exit
PB: predicated region body
PF: predicated region fallthrough
CT: control target
= control target key end

     0   :  { %s581_s0 = inlined_call_operand.hbm [shape: f32[8,16], index: 0, kind: input, shape index: {}]   ;;  %s582_s1 = inlined_call_operand.hbm [shape: f32[16,32], index: 1, kind: input, shape index: {}]   ;;  %s583_s2 = inlined_call_operand.hbm [shape: f32[1,32], index: 2, kind: input, shape index: {}]   ;;  %s584_s3 = inlined_call_operand.hbm [shape: f32[5,32,32], index: 3, kind: input, shape index: {}]   ;;  %s585_s4 = inlined_call_operand.vmem [shape: f32[5,1,32], index: 4, kind: input, shape index: {}]   ;;  %s586_s5 = inlined_call_operand.vmem [shape: f32[1,32], index: 5, kind: input, shape index: {}]   ;;  %s587_s6 = inlined_call_operand.<no memory space> [shape: f32[1,1], index: 6, kind: input, shape index: {}]   ;;  %s588_s7 = inlined_call_operand.vmem [shape: f32[8,1], index: 7, kind: output, shape index: {0}]   ;;  %s589_s8 = inlined_call_operand.hbm [shape: f32[8,32], index: 8, kind: output, shape index: {1}]  }
   0x1   :  { %v14_v0 = vstv %s587_s6 }
   0x2   :  { %15 = vst [vmem:[#allocation2] sm:$0x1] %v14_v0 }
   0x3   :  { %16 = vsyncpa [#allocation4], 0 }
   0x4   :  { %17 = vsyncpa [#allocation7], 0 }
   0x5   :  { %18 = vsyncpa [#allocation10], 0  ;;  %s35_s9 = sshll.u32 %s582_s1, 4  ;;  %s36_s9 = int_to_ptr.hbm [resolvable:$true] %s35_s9 }
   0x6   :  { %19 = vsyncpa [#allocation5], 0  ;;  %s483_s10 = smov [#allocation6]   ;;  %s25_s14 = sshll.u32 %s581_s0, 4  ;;  %s26_s14 = int_to_ptr.hbm [resolvable:$true] %s25_s14 }
   0x7   :  { %s37_s11 = sshll.u32 %s483_s10, 4  ;;  %s484_s15 = smov 128   ;;  %s38_s11 = int_to_ptr.vmem [resolvable:$true] %s37_s11 }
   0x8   :  { %s485_s16 = smov 8   ;;  %s486_s6 = smov [#allocation3]  }
   0x9   :  { %43 = dma.hbm_to_vmem [thread:$0]  %s36_s9, 256, %s38_s11, [#allocation7], %s484_s15, %s484_s15, %s485_s16  }
   0xa   :  { %s27_s17 = sshll.u32 %s486_s6, 4  ;;  %s49_s20 = sshll.u32 %s583_s2, 4  ;;  %s28_s17 = int_to_ptr.vmem [resolvable:$true] %s27_s17  ;;  %s50_s20 = int_to_ptr.hbm [resolvable:$true] %s49_s20 }
   0xb   :  { %30 = dma.hbm_to_vmem [thread:$0]  %s26_s14, 128, %s28_s17, [#allocation4]  }
   0xc   :  { %s59_s22 = sshll.u32 %s584_s3, 4  ;;  %s487_s23 = smov [#allocation8]   ;;  %s60_s22 = int_to_ptr.hbm [resolvable:$true] %s59_s22 }
   0xd   :  { %s51_s24 = sshll.u32 %s487_s23, 4  ;;  %s488_s0 = smov [#allocation9]   ;;  %s52_s24 = int_to_ptr.vmem [resolvable:$true] %s51_s24 }
   0xe   :  { %54 = dma.hbm_to_vmem [thread:$0]  %s50_s20, 16, %s52_s24, [#allocation7]  }
   0xf   :  { %s61_s25 = sshll.u32 %s488_s0, 4  ;;  %s62_s25 = int_to_ptr.vmem [resolvable:$true] %s61_s25 }
  0x10   :  { %67 = dma.hbm_to_vmem [thread:$0]  %s60_s22, 2560, %s62_s25, [#allocation10], %s484_s15, %s484_s15, %s485_s16  }
  0x11   :  { %475 = dma.done.wait [#allocation4], 128  }
  0x12   :  { %476 = vsyncadd [#allocation4], 4294967168 }
  0x13   :  { %477 = dma.done.wait [#allocation7], 272  }
  0x14   :  { %478 = vsyncadd [#allocation7], 4294967024 }
  0x15   :  { %479 = dma.done.wait [#allocation10], 2560  }
  0x16   :  { %480 = vsyncadd [#allocation10], 4294964736  ;;  %v92_v1 = vld [vmem:[#allocation6 + $0x8] sm:$0xff]  ;;  %v91_v2 = vld [vmem:[#allocation6] sm:$0xff]  ;;  %vm97_vm0 = vcmask 130048   ;;  %vm130_vm1 = vcmask 261120  }
  0x17   :  { %115 = vmatpush.msra.mxu0 %v92_v1  ;;  %v90_v3 = vld [vmem:[#allocation3] sm:$0xff]  ;;  %v125_v4 = vld [vmem:[#allocation9 + $0x18] sm:$0xff]  ;;  %v124_v5 = vld [vmem:[#allocation9 + $0x10] sm:$0xff]  ;;  %s489_s12 = smov [#allocation11]   ;;  %s316_s16 = sshll.u32 %s589_s8, 4  ;;  %vm305_vm2 = vcmask 7168   ;;  %s317_s16 = int_to_ptr.hbm [resolvable:$true] %s316_s16 }
  0x18   :  { %146 = vmatpush.msra.mxu1 %v125_v4  ;;  %v123_v6 = vld [vmem:[#allocation9 + $0x8] sm:$0xff]  ;;  %v122_v7 = vld [vmem:[#allocation9] sm:$0xff]  ;;  %v159_v8 = vld [vmem:[#allocation9 + $0x38] sm:$0xff]  ;;  %s314_s13 = sshll.u32 %s489_s12, 4  ;;  %s315_s13 = int_to_ptr.vmem [resolvable:$true] %s314_s13 }
  0x19   :  { %116 = vmatpush.msra.mxu0 %v91_v2  ;;  %180 = vmatpush.msra.mxu2 %v159_v8  ;;  %v347_v9 = vld [vmem:[#allocation8] ss:$0 sm:$0xff]  ;;  %v158_v13 = vld [vmem:[#allocation9 + $0x30] sm:$0xff]  ;;  %v157_v14 = vld [vmem:[#allocation9 + $0x28] sm:$0xff] }
  0x1a   :  { %330 = vmatmul.msk.f32.vlgmr.msra.gmra.mxu0 %vm97_vm0, %v90_v3  ;;  %147 = vmatpush.msra.mxu1 %v124_v5  ;;  %v156_v15 = vld [vmem:[#allocation9 + $0x20] sm:$0xff]  ;;  %v193_v16 = vld [vmem:[#allocation9 + $0x58] sm:$0xff]  ;;  %v192_v21 = vld [vmem:[#allocation9 + $0x50] sm:$0xff] }
  0x1b   :  { %181 = vmatpush.msra.mxu2 %v158_v13  ;;  %214 = vmatpush.msra.mxu3 %v193_v16  ;;  %v348_v17 = vld [vmem:[%s585_s4] ss:$0 sm:$0xff]  ;;  %v191_v22 = vld [vmem:[#allocation9 + $0x48] sm:$0xff]  ;;  %v227_v24 = vld [vmem:[#allocation9 + $0x78] sm:$0xff] }
  0x1c   :  { %148 = vmatpush.msra.mxu1 %v123_v6  ;;  %v190_v23 = vld [vmem:[#allocation9 + $0x40] sm:$0xff]  ;;  %v226_v25 = vld [vmem:[#allocation9 + $0x70] sm:$0xff]  ;;  %248 = vmatpush.msrb.mxu0 %v227_v24  ;;  %v225_v30 = vld [vmem:[#allocation9 + $0x68] sm:$0xff] }
  0x1d   :  { %182 = vmatpush.msra.mxu2 %v157_v14  ;;  %215 = vmatpush.msra.mxu3 %v192_v21  ;;  %v349_v26 = vld [vmem:[%s585_s4 + $0x1] ss:$0 sm:$0xff]  ;;  %v261_v32 = vld [vmem:[#allocation9 + $0x98] sm:$0xff]  ;;  %v260_v33 = vld [vmem:[#allocation9 + $0x90] sm:$0xff] }
  0x1e   :  { %149 = vmatpush.msra.mxu1 %v122_v7  ;;  %249 = vmatpush.msrb.mxu0 %v226_v25  ;;  %v224_v31 = vld [vmem:[#allocation9 + $0x60] sm:$0xff]  ;;  %v259_v38 = vld [vmem:[#allocation9 + $0x88] sm:$0xff] }
  0x1f   :  { %183 = vmatpush.msra.mxu2 %v156_v15  ;;  %216 = vmatpush.msra.mxu3 %v191_v22  ;;  %v350_v34 = vld [vmem:[%s585_s4 + $0x2] ss:$0 sm:$0xff]  ;;  %v351_v40 = vld [vmem:[%s585_s4 + $0x3] ss:$0 sm:$0xff]  ;;  %v352_v44 = vld [vmem:[%s585_s4 + $0x4] ss:$0 sm:$0xff] }
  0x20   :  { %250 = vmatpush.msrb.mxu0 %v225_v30  ;;  %282 = vmatpush.msrb.mxu1 %v261_v32  ;;  %v258_v39 = vld [vmem:[#allocation9 + $0x80] sm:$0xff] }
  0x21   :  { %217 = vmatpush.msra.mxu3 %v190_v23  ;;  %v353_v47 = vld [vmem:[%s586_s5] ss:$0 sm:$0xff] }
  0x22   :  { %251 = vmatpush.msrb.mxu0 %v224_v31  ;;  %283 = vmatpush.msrb.mxu1 %v260_v33  ;;  %v354_v51 = vld [vmem:[#allocation2] ss:$0 sm:$0xff] }
  0x24   :  { %284 = vmatpush.msrb.mxu1 %v259_v38 }
  0x26   :  { %285 = vmatpush.msrb.mxu1 %v258_v39 }
  0x97   :  { %v118_v10 = vpop.f32.mrf.mxu0 }
  0x98   :  { %v119_v11 = vadd.f32 %v347_v9, %v118_v10 }
  0x9a   :  { %v121_v12 = vmax.f32 %v119_v11, 0.0 }
  0x9c   :  { %331 = vmatmul.msk.f32.vlgmr.msra.gmra.mxu1 %vm130_vm1, %v121_v12 }
 0x119   :  { %v151_v18 = vpop.f32.mrf.mxu1 }
 0x11a   :  { %v152_v19 = vadd.f32 %v348_v17, %v151_v18 }
 0x11c   :  { %v154_v20 = vmax.f32 %v152_v19, 0.0 }
 0x11e   :  { %333 = vmatmul.msk.f32.vlgmr.msra.gmra.mxu2 %vm130_vm1, %v154_v20 }
 0x1a1   :  { %v185_v27 = vpop.f32.mrf.mxu2 }
 0x1a2   :  { %v186_v28 = vadd.f32 %v349_v26, %v185_v27 }
 0x1a4   :  { %v188_v29 = vmax.f32 %v186_v28, 0.0 }
 0x1a6   :  { %335 = vmatmul.msk.f32.vlgmr.msra.gmra.mxu3 %vm130_vm1, %v188_v29 }
 0x229   :  { %v219_v35 = vpop.f32.mrf.mxu3 }
 0x22a   :  { %v220_v36 = vadd.f32 %v350_v34, %v219_v35 }
 0x22c   :  { %v222_v37 = vmax.f32 %v220_v36, 0.0 }
 0x22e   :  { %337 = vmatmul.msk.f32.vlgmr.msrb.gmra.mxu0 %vm130_vm1, %v222_v37 }
 0x2ab   :  { %v253_v41 = vpop.f32.mrf.mxu0 }
 0x2ac   :  { %v254_v42 = vadd.f32 %v351_v40, %v253_v41 }
 0x2ae   :  { %v256_v43 = vmax.f32 %v254_v42, 0.0 }
 0x2b0   :  { %339 = vmatmul.msk.f32.vlgmr.msrb.gmra.mxu1 %vm130_vm1, %v256_v43 }
 0x32d   :  { %v287_v45 = vpop.f32.mrf.mxu1 }
 0x32e   :  { %v288_v46 = vadd.f32 %v352_v44, %v287_v45 }
 0x330   :  { %v290_v48 = vmax.f32 %v288_v46, 0.0 }
 0x332   :  { %291 = vst.msk [vmem:[#allocation11] sm:$0xff] %vm130_vm1, %v290_v48  ;;  %v296_v49 = vmul.f32 %v353_v47, %v290_v48 }
 0x333   :  { %319 = dma.vmem_to_hbm [thread:$0]  %s315_s13, 128, %s317_s16, [#allocation5]  }
 0x334   :  { %v297_v50 = vsel %vm130_vm1, %v296_v49, 0.0 }
 0x335   :  { %298 = vadd.xlane.f32.xlu0 %v297_v50 }
 0x3a8   :  { %v299_v52 = vpop.xlane.xlu0 %298 }
 0x3a9   :  { %v304_v53 = vadd.f32 %v354_v51, %v299_v52 }
 0x3ab   :  { %306 = vst.msk [vmem:[%s588_s7] sm:$0xff] %vm305_vm2, %v304_v53 }
 0x3ac   :  { %481 = dma.done.wait [#allocation5], 128  }
 0x3ad   :  { %482 = vsyncadd [#allocation5], 4294967168 }
 0x3ae   :  { %326 = vsyncpa [#allocation4], 1 }
 0x3af   :  { %327 = vsyncpa [#allocation7], 1 }
 0x3b0   :  { %328 = vsyncpa [#allocation10], 1 }
 0x3b1   :  { %329 = vsyncpa [#allocation5], 1 }

</bundles_post_ra>
